<compile_context>
chip_gen: v7x
topology: tpu7x:2x2x1
jax: 0.10.0
libtpu: 0.0.40
codegen_flags: <defaults>
</compile_context>

<pallas_src>
import jax
import jax.numpy as jnp
import numpy as np
from jax import lax
from jax.experimental import pallas as pl
from jax.experimental.pallas import tpu as pltpu


PAD = 128  # lane-dense padded feature width for all activations / weights


def _round_up(x, m):
    return ((x + m - 1) // m) * m


def _pick_block_b(B):
    """Bounded batch-tile size: >=4 grid steps for B>=128, 512-1024 row tiles
    for large B, always a multiple of 8 (sublane constraint)."""
    if B < 128:
        return _round_up(max(B, 8), 8)          # single tiny step (launch-bound anyway)
    if B <= 4096:
        return min(512, _round_up(-(-B // 4), 8))  # >=4 steps, <=512 rows
    return 1024


def make_mdn_kernel(n_hidden, num_gaussians):
    """Kernel closed over the (static) trunk depth and mixture count."""
    G = num_gaussians

    def kernel(x_ref, w_ref, b_ref, out_ref):
        # x_ref:   (block_b, PAD)            zero-padded inputs (f32)
        # w_ref:   (n_hidden + 1, PAD, PAD)  zero-padded [in, out] weights (bf16 or f32)
        # b_ref:   (n_hidden + 1, PAD)       zero-padded biases (f32)
        # out_ref: (block_b, PAD)            [pi | mu | sigma | zero-pad] (f32)
        h = x_ref[...].astype(jnp.float32)

        # Hidden trunk: Linear -> ReLU (-> Dropout, identity in eval mode).
        # Zero padding is self-consistent: padded weight rows/cols and bias
        # entries are 0, so padded activation columns stay exactly 0.
        # Matmul operands are cast to the weight-slab dtype (bf16 on MXU);
        # accumulation and all elementwise math stay f32.
        for i in range(n_hidden):
            h = jnp.dot(h.astype(w_ref.dtype), w_ref[i],
                        preferred_element_type=jnp.float32)
            h = jnp.maximum(h + b_ref[i:i + 1, :], 0.0)

        # Fused head matmul: one MXU push for all three heads.
        z = (jnp.dot(h.astype(w_ref.dtype), w_ref[n_hidden],
                     preferred_element_type=jnp.float32)
             + b_ref[n_hidden:n_hidden + 1, :])

        col = lax.broadcasted_iota(jnp.int32, z.shape, 1)
        is_pi = col < G
        is_sigma = (col >= 2 * G) & (col < 3 * G)

        # pi head: masked softmax over the first G columns (torch dim=1).
        logits = jnp.where(is_pi, z, -jnp.inf)
        m = jnp.max(logits, axis=-1, keepdims=True)
        e = jnp.where(is_pi, jnp.exp(logits - m), 0.0)
        denom = jnp.sum(e, axis=-1, keepdims=True)
        pi = e / denom  # exact division: mixture weights must sum to 1

        # sigma head: softplus(clamp(raw, -10, 10)) + 1e-6.
        s = jnp.clip(z, -10.0, 10.0)
        sigma = jnp.log1p(jnp.exp(s)) + 1e-6

        # mu (and the zero-padded tail) pass through z unchanged.
        out_ref[...] = jnp.where(is_pi, pi, jnp.where(is_sigma, sigma, z))

    return kernel


def init_linear(key, in_dim, out_dim):
    """PyTorch nn.Linear default init: U(-1/sqrt(in), 1/sqrt(in))."""
    kw, kb = jax.random.split(key)
    bound = 1.0 / np.sqrt(in_dim)
    w = jax.random.uniform(kw, (out_dim, in_dim), jnp.float32, -bound, bound)
    b = jax.random.uniform(kb, (out_dim,), jnp.float32, -bound, bound)
    return w, b


def mdn_forward(x, params, matmul_dtype=jnp.bfloat16):
    """params: dict with 'hidden' = list of (W[out,in], b[out]) and head weights."""
    n_hidden = len(params["hidden"])
    n_mats = n_hidden + 1
    B, in_dim = x.shape
    G = params["pi"][0].shape[0]
    assert 3 * G <= PAD and in_dim <= PAD
    assert all(w.shape[0] <= PAD and w.shape[1] <= PAD for w, _ in params["hidden"])

    # --- Pack operands into three slabs (x, weights, biases). ---------------
    w_slab = jnp.zeros((n_mats, PAD, PAD), jnp.float32)
    b_slab = jnp.zeros((n_mats, PAD), jnp.float32)
    for i, (w, b) in enumerate(params["hidden"]):
        wt = w.T  # [in, out]
        w_slab = w_slab.at[i, :wt.shape[0], :wt.shape[1]].set(wt)
        b_slab = b_slab.at[i, :b.shape[0]].set(b)

    # Fused head: [Wpi | Wmu | Wsig] along the output axis.
    w_head = jnp.concatenate(
        [params["pi"][0].T, params["mu"][0].T, params["sigma"][0].T], axis=1)
    b_head = jnp.concatenate(
        [params["pi"][1], params["mu"][1], params["sigma"][1]], axis=0)
    w_slab = w_slab.at[n_hidden, :w_head.shape[0], :w_head.shape[1]].set(w_head)
    b_slab = b_slab.at[n_hidden, :b_head.shape[0]].set(b_head)
    w_slab = w_slab.astype(matmul_dtype)  # bf16 matmul operands (f32 accumulate)

    # --- Bounded batch tiling with zero-padded remainder. -------------------
    block_b = _pick_block_b(B)
    Bp = _round_up(B, block_b)
    x_pad = jnp.zeros((Bp, PAD), jnp.float32).at[:B, :in_dim].set(x)
    grid = (Bp // block_b,)

    out = pl.pallas_call(
        make_mdn_kernel(n_hidden, G),
        out_shape=jax.ShapeDtypeStruct((Bp, PAD), jnp.float32),
        grid=grid,
        in_specs=[
            pl.BlockSpec((block_b, PAD), lambda i: (i, 0)),
            # Grid-invariant index_maps -> weight/bias slabs are DMA'd once.
            pl.BlockSpec((n_mats, PAD, PAD), lambda i: (0, 0, 0)),
            pl.BlockSpec((n_mats, PAD), lambda i: (0, 0)),
        ],
        out_specs=pl.BlockSpec((block_b, PAD), lambda i: (i, 0)),
        compiler_params=pltpu.CompilerParams(
            dimension_semantics=("parallel",)),
    )(x_pad, w_slab, b_slab)

    pi = out[:B, :G]
    mu = out[:B, G:2 * G]
    sigma = out[:B, 2 * G:3 * G]
    return pi, mu, sigma


def mdn_reference(x, params):
    """Pure-JAX reference mirroring the PyTorch forward (eval mode)."""
    hp = lax.Precision.HIGHEST
    h = x
    for (w, b) in params["hidden"]:
        h = jnp.maximum(jnp.dot(h, w.T, precision=hp) + b, 0.0)
    pi = jax.nn.softmax(jnp.dot(h, params["pi"][0].T, precision=hp) + params["pi"][1], axis=1)
    mu = jnp.dot(h, params["mu"][0].T, precision=hp) + params["mu"][1]
    s = jnp.clip(jnp.dot(h, params["sigma"][0].T, precision=hp) + params["sigma"][1], -10.0, 10.0)
    sigma = jnp.log1p(jnp.exp(s)) + 1e-6
    return pi, mu, sigma


def _check(actual, desired, rtol, atol):
    for a, d in zip(actual, desired):
        np.testing.assert_allclose(np.asarray(a), np.asarray(d), rtol=rtol, atol=atol)


if __name__ == "__main__":
    # Module config: input_size=16, hidden_layers=[32, 64] (last must be 64 to
    # match the hard-coded Linear(64, num_gaussians) heads), num_gaussians=8.
    input_size = 16
    hidden_layers = [32, 64]
    num_gaussians = 8
    batch = 8

    key = jax.random.PRNGKey(0)
    keys = jax.random.split(key, 3 + len(hidden_layers) + 3)

    x = jax.random.normal(keys[0], (batch, input_size), jnp.float32)

    params = {"hidden": []}
    layer_sizes = [input_size] + hidden_layers
    for i in range(len(layer_sizes) - 1):
        params["hidden"].append(
            init_linear(keys[1 + i], layer_sizes[i], layer_sizes[i + 1])
        )
    k_heads = keys[1 + len(hidden_layers):]
    params["pi"] = init_linear(k_heads[0], 64, num_gaussians)
    params["mu"] = init_linear(k_heads[1], 64, num_gaussians)
    params["sigma"] = init_linear(k_heads[2], 64, num_gaussians)

    # --- 1) f32 matmul path: tight validation. ------------------------------
    out_f32 = mdn_forward(x, params, matmul_dtype=jnp.float32)
    jax.block_until_ready(out_f32)
    ref = mdn_reference(x, params)
    _check(out_f32, ref, rtol=1e-4, atol=1e-5)

    # --- 2) bf16 matmul-operand path (production default): loose validation.-
    out_bf16 = mdn_forward(x, params, matmul_dtype=jnp.bfloat16)
    jax.block_until_ready(out_bf16)
    _check(out_bf16, ref, rtol=1e-1, atol=5e-2)

    # --- 3) Larger, non-multiple batch: exercises bounded tiles + remainder
    #        padding + a multi-step ("parallel") grid. -----------------------
    x_large = jax.random.normal(keys[-1], (300, input_size), jnp.float32)
    out_large = mdn_forward(x_large, params, matmul_dtype=jnp.float32)
    jax.block_until_ready(out_large)
    ref_large = mdn_reference(x_large, params)
    _check(out_large, ref_large, rtol=1e-4, atol=1e-5)

    print("KERNEL_OK")
</pallas_src>

<mosaic_0001>
module attributes {stable_mosaic.version = 11 : i64} {
  func.func @kernel(%arg0: i32, %arg1: memref<8x128xf32, #tpu.memory_space<vmem>>, %arg2: memref<3x128x128xf32, #tpu.memory_space<vmem>>, %arg3: memref<3x128xf32, #tpu.memory_space<vmem>>, %arg4: memref<8x128xf32, #tpu.memory_space<vmem>>) attributes {dimension_semantics = [#tpu.dimension_semantics<parallel>], iteration_bounds = array<i64: 1>, scalar_prefetch = 0 : i64, scratch_operands = 0 : i64, tpu.core_type = #tpu.core_type<tc>, window_params = [{transform_indices = @transform_0, window_bounds = array<i64: 8, 128>}, {pipeline_mode = #tpu.pipeline_mode<synchronous>, transform_indices = @transform_1, window_bounds = array<i64: 3, 128, 128>}, {pipeline_mode = #tpu.pipeline_mode<synchronous>, transform_indices = @transform_2, window_bounds = array<i64: 3, 128>}, {transform_indices = @transform_3, window_bounds = array<i64: 8, 128>}]} {
    %c0 = arith.constant 0 : index
    %c0_0 = arith.constant 0 : index
    %0 = vector.load %arg1[%c0, %c0_0] : memref<8x128xf32, #tpu.memory_space<vmem>>, vector<8x128xf32>
    %c0_1 = arith.constant 0 : index
    %c0_2 = arith.constant 0 : index
    %c0_3 = arith.constant 0 : index
    %1 = vector.load %arg2[%c0_1, %c0_2, %c0_3] : memref<3x128x128xf32, #tpu.memory_space<vmem>>, vector<1x128x128xf32>
    %2 = vector.shape_cast %1 : vector<1x128x128xf32> to vector<128x128xf32>
    %cst = arith.constant dense<0.000000e+00> : vector<8x128xf32>
    %3 = tpu.matmul %0, %2, %cst {dimension_numbers = #tpu.dot_dimension_numbers<[1], [0], [0], [1], [0, 0, 1, 1], [], []>} : vector<8x128xf32>, vector<128x128xf32>, vector<8x128xf32> -> vector<8x128xf32>
    %c0_4 = arith.constant 0 : index
    %c0_5 = arith.constant 0 : index
    %4 = vector.load %arg3[%c0_4, %c0_5] : memref<3x128xf32, #tpu.memory_space<vmem>>, vector<1x128xf32>
    %5 = vector.broadcast %4 : vector<1x128xf32> to vector<8x128xf32>
    %6 = arith.addf %3, %5 : vector<8x128xf32>
    %cst_6 = arith.constant 0.000000e+00 : f32
    %7 = vector.broadcast %cst_6 : f32 to vector<8x128xf32>
    %8 = arith.maximumf %6, %7 : vector<8x128xf32>
    %c1 = arith.constant 1 : index
    %c0_7 = arith.constant 0 : index
    %c0_8 = arith.constant 0 : index
    %9 = vector.load %arg2[%c1, %c0_7, %c0_8] : memref<3x128x128xf32, #tpu.memory_space<vmem>>, vector<1x128x128xf32>
    %10 = vector.shape_cast %9 : vector<1x128x128xf32> to vector<128x128xf32>
    %cst_9 = arith.constant dense<0.000000e+00> : vector<8x128xf32>
    %11 = tpu.matmul %8, %10, %cst_9 {dimension_numbers = #tpu.dot_dimension_numbers<[1], [0], [0], [1], [0, 0, 1, 1], [], []>} : vector<8x128xf32>, vector<128x128xf32>, vector<8x128xf32> -> vector<8x128xf32>
    %c1_10 = arith.constant 1 : index
    %c0_11 = arith.constant 0 : index
    %12 = vector.load %arg3[%c1_10, %c0_11] : memref<3x128xf32, #tpu.memory_space<vmem>>, vector<1x128xf32>
    %13 = vector.broadcast %12 : vector<1x128xf32> to vector<8x128xf32>
    %14 = arith.addf %11, %13 : vector<8x128xf32>
    %cst_12 = arith.constant 0.000000e+00 : f32
    %15 = vector.broadcast %cst_12 : f32 to vector<8x128xf32>
    %16 = arith.maximumf %14, %15 : vector<8x128xf32>
    %c2 = arith.constant 2 : index
    %c0_13 = arith.constant 0 : index
    %c0_14 = arith.constant 0 : index
    %17 = vector.load %arg2[%c2, %c0_13, %c0_14] : memref<3x128x128xf32, #tpu.memory_space<vmem>>, vector<1x128x128xf32>
    %18 = vector.shape_cast %17 : vector<1x128x128xf32> to vector<128x128xf32>
    %cst_15 = arith.constant dense<0.000000e+00> : vector<8x128xf32>
    %19 = tpu.matmul %16, %18, %cst_15 {dimension_numbers = #tpu.dot_dimension_numbers<[1], [0], [0], [1], [0, 0, 1, 1], [], []>} : vector<8x128xf32>, vector<128x128xf32>, vector<8x128xf32> -> vector<8x128xf32>
    %c2_16 = arith.constant 2 : index
    %c0_17 = arith.constant 0 : index
    %20 = vector.load %arg3[%c2_16, %c0_17] : memref<3x128xf32, #tpu.memory_space<vmem>>, vector<1x128xf32>
    %21 = vector.broadcast %20 : vector<1x128xf32> to vector<8x128xf32>
    %22 = arith.addf %19, %21 : vector<8x128xf32>
    %23 = tpu.iota {dimensions = array<i32: 1>} : vector<8x128xi32>
    %c8_i32 = arith.constant 8 : i32
    %24 = vector.broadcast %c8_i32 : i32 to vector<8x128xi32>
    %25 = arith.cmpi slt, %23, %24 : vector<8x128xi32>
    %c16_i32 = arith.constant 16 : i32
    %26 = vector.broadcast %c16_i32 : i32 to vector<8x128xi32>
    %27 = arith.cmpi sge, %23, %26 : vector<8x128xi32>
    %c24_i32 = arith.constant 24 : i32
    %28 = vector.broadcast %c24_i32 : i32 to vector<8x128xi32>
    %29 = arith.cmpi slt, %23, %28 : vector<8x128xi32>
    %30 = arith.andi %27, %29 : vector<8x128xi1>
    %cst_18 = arith.constant 0xFF800000 : f32
    %31 = vector.broadcast %cst_18 : f32 to vector<8x128xf32>
    %32 = arith.select %25, %22, %31 : vector<8x128xi1>, vector<8x128xf32>
    %cst_19 = arith.constant dense<0xFF800000> : vector<8xf32>
    %33 = vector.multi_reduction <maximumf>, %32, %cst_19 [1] : vector<8x128xf32> to vector<8xf32>
    %34 = vector.shape_cast %33 : vector<8xf32> to vector<8x1xf32>
    %35 = vector.broadcast %34 : vector<8x1xf32> to vector<8x128xf32>
    %36 = arith.subf %32, %35 : vector<8x128xf32>
    %37 = math.exp %36 : vector<8x128xf32>
    %cst_20 = arith.constant 0.000000e+00 : f32
    %38 = vector.broadcast %cst_20 : f32 to vector<8x128xf32>
    %39 = arith.select %25, %37, %38 : vector<8x128xi1>, vector<8x128xf32>
    %cst_21 = arith.constant dense<0.000000e+00> : vector<8xf32>
    %40 = vector.multi_reduction <add>, %39, %cst_21 [1] : vector<8x128xf32> to vector<8xf32>
    %41 = vector.shape_cast %40 : vector<8xf32> to vector<8x1xf32>
    %42 = vector.broadcast %41 : vector<8x1xf32> to vector<8x128xf32>
    %43 = arith.divf %39, %42 : vector<8x128xf32>
    %cst_22 = arith.constant -1.000000e+01 : f32
    %cst_23 = arith.constant 1.000000e+01 : f32
    %44 = vector.broadcast %cst_22 : f32 to vector<8x128xf32>
    %45 = arith.maximumf %44, %22 : vector<8x128xf32>
    %46 = vector.broadcast %cst_23 : f32 to vector<8x128xf32>
    %47 = arith.minimumf %46, %45 : vector<8x128xf32>
    %48 = math.exp %47 : vector<8x128xf32>
    %49 = math.log1p %48 : vector<8x128xf32>
    %cst_24 = arith.constant 9.99999997E-7 : f32
    %50 = vector.broadcast %cst_24 : f32 to vector<8x128xf32>
    %51 = arith.addf %49, %50 : vector<8x128xf32>
    %52 = arith.select %30, %51, %22 : vector<8x128xi1>, vector<8x128xf32>
    %53 = arith.select %25, %43, %52 : vector<8x128xi1>, vector<8x128xf32>
    %c0_25 = arith.constant 0 : index
    %c0_26 = arith.constant 0 : index
    %54 = vector.load %arg4[%c0_25, %c0_26] : memref<8x128xf32, #tpu.memory_space<vmem>>, vector<8x128xf32>
    tpu.vector_store %arg4[%c0_25, %c0_26], %53 {strides = array<i32>} : memref<8x128xf32, #tpu.memory_space<vmem>>, vector<8x128xf32>,
    return
  }
  func.func @transform_0(%arg0: i32) -> (i32, i32) {
    %c0_i32 = arith.constant 0 : i32
    %c0_i32_0 = arith.constant 0 : i32
    return %arg0, %c0_i32 : i32, i32
  }
  func.func @transform_1(%arg0: i32) -> (i32, i32, i32) {
    %c0_i32 = arith.constant 0 : i32
    %c0_i32_0 = arith.constant 0 : i32
    %c0_i32_1 = arith.constant 0 : i32
    %c0_i32_2 = arith.constant 0 : i32
    return %c0_i32, %c0_i32_0, %c0_i32_1 : i32, i32, i32
  }
  func.func @transform_2(%arg0: i32) -> (i32, i32) {
    %c0_i32 = arith.constant 0 : i32
    %c0_i32_0 = arith.constant 0 : i32
    %c0_i32_1 = arith.constant 0 : i32
    return %c0_i32, %c0_i32_0 : i32, i32
  }
  func.func @transform_3(%arg0: i32) -> (i32, i32) {
    %c0_i32 = arith.constant 0 : i32
    %c0_i32_0 = arith.constant 0 : i32
    return %arg0, %c0_i32 : i32, i32
  }
}

</mosaic_0001>

<bundles_post_ra>
// kernel: tpu_custom_call.1
= control target key start
LH: loop header
LB: loop body
LE: loop exit
PB: predicated region body
PF: predicated region fallthrough
CT: control target
= control target key end

     0   :  { %8 = vsyncpa [#allocation3], 0  ;;  %s808_s0 = inlined_call_operand.hbm [shape: f32[8,128], index: 0, kind: input, shape index: {}]   ;;  %s809_s1 = inlined_call_operand.hbm [shape: f32[3,128,128], index: 1, kind: input, shape index: {}]   ;;  %s810_s2 = inlined_call_operand.vmem [shape: f32[3,128], index: 2, kind: input, shape index: {}]   ;;  %s811_s3 = inlined_call_operand.hbm [shape: f32[8,128], index: 3, kind: output, shape index: {}]  }
   0x1   :  { %9 = vsyncpa [#allocation6], 0 }
   0x2   :  { %10 = vsyncpa [#allocation4], 0  ;;  %s689_s12 = smov [#allocation2]   ;;  %s690_s14 = smov [#allocation5]  }
   0x3   :  { %s17_s13 = sshll.u32 %s689_s12, 4  ;;  %s26_s15 = sshll.u32 %s690_s14, 4  ;;  %s18_s13 = int_to_ptr.vmem [resolvable:$true] %s17_s13  ;;  %s717_s15 = int_to_ptr.vmem [resolvable:$true] %s26_s15 }
   0x4   :  { %s617_s18 = scalar_lea.hbm %s808_s0, 128 }
   0x5   :  { %p618_p0 = scmp.ne.s32.totalorder %s808_s0, %s617_s18  ;;  %p621_p1 = scmp.lt.u32.totalorder %s617_s18, %s808_s0 }
   0x7   :  { %p623_p2 = pnand %p621_p1, %p618_p0 }
   0x9   :  { %626 = shalt.err (!%p623_p2)
}
   0xa   :  { %s627_s23 = scalar_lea.vmem %s18_s13, 128  ;;  %p632_p4 = scmp.lt.s32.totalorder %s18_s13, %s18_s13 }
   0xb   :  { %p628_p3 = scmp.ne.s32.totalorder %s18_s13, %s627_s23  ;;  %p633_p5 = scmp.lt.s32.totalorder %s627_s23, %s627_s23 }
   0xd   :  { %p634_p6 = por %p633_p5, %p632_p4 }
   0xf   :  { %p635_p7 = pnand %p634_p6, %p628_p3 }
  0x11   :  { %638 = shalt.err (!%p635_p7)
}
  0x12   :  { %20 = dma.hbm_to_vmem [thread:$0]  %s808_s0, 128, %s18_s13, [#allocation3]  }
  0x13   :  { %s639_s28 = scalar_lea.hbm %s809_s1, 6144 }
  0x14   :  { %p640_p8 = scmp.ne.s32.totalorder %s809_s1, %s639_s28  ;;  %p643_p9 = scmp.lt.u32.totalorder %s639_s28, %s809_s1 }
  0x16   :  { %p645_p10 = pnand %p643_p9, %p640_p8 }
  0x18   :  { %648 = shalt.err (!%p645_p10)
}
  0x19   :  { %s649_s6 = scalar_lea.vmem %s717_s15, 6144  ;;  %p654_p12 = scmp.lt.s32.totalorder %s717_s15, %s717_s15 }
  0x1a   :  { %p650_p11 = scmp.ne.s32.totalorder %s717_s15, %s649_s6  ;;  %p655_p13 = scmp.lt.s32.totalorder %s649_s6, %s649_s6 }
  0x1c   :  { %p656_p0 = por %p655_p13, %p654_p12 }
  0x1e   :  { %p657_p1 = pnand %p656_p0, %p650_p11 }
  0x20   :  { %660 = shalt.err (!%p657_p1)
}
  0x21   :  { %s691_s0 = smov 128   ;;  %s692_s7 = smov 8  }
  0x22   :  { %32 = dma.hbm_to_vmem [thread:$0]  %s809_s1, 6144, %s717_s15, [#allocation6], %s691_s0, %s691_s0, %s692_s7  }
  0x23   :  { %683 = dma.done.wait [#allocation3], 128  }
  0x24   :  { %684 = vsyncadd [#allocation3], 4294967168 }
  0x25   :  { %685 = dma.done.wait [#allocation6], 6144  }
  0x26   :  { %686 = vsyncadd [#allocation6], 4294961152  ;;  %v693_v0 = vmov 0.0|0.0   ;;  %vm694_vm0 = vmmov 0   ;;  %v695_v1 = vmov 0.0   ;;  %v42_v2 = vld [vmem:[#allocation5] sm:$0xff] }
  0x27   :  { %529 = vmatprep.subr.bf16.mxu0 %v693_v0  ;;  %456 = vmatprep.mubr.msk.f32.mxu0 %vm694_vm0, %v695_v1  ;;  %v43_v3 = vld [vmem:[#allocation5 + $0x8] sm:$0xff]  ;;  %v44_v4 = vld [vmem:[#allocation5 + $0x10] sm:$0xff]  ;;  %v45_v6 = vld [vmem:[#allocation5 + $0x18] sm:$0xff] }
  0x28   :  { %553 = vmatprep.subr.bf16.mxu1 %v693_v0  ;;  %491 = vmatprep.mubr.msk.f32.mxu1 %vm694_vm0, %v695_v1  ;;  %v530_v5 = vpack.c.bf16 %v43_v3, %v42_v2  ;;  %v533_v7 = vpack.c.bf16 %v45_v6, %v44_v4  ;;  %v46_v8 = vld [vmem:[#allocation5 + $0x20] sm:$0xff]  ;;  %v47_v9 = vld [vmem:[#allocation5 + $0x28] sm:$0xff]  ;;  %v137_v12 = vld [vmem:[#allocation5 + $0x90] sm:$0xff] }
  0x29   :  { %v135_v10 = vld [vmem:[#allocation5 + $0x80] sm:$0xff]  ;;  %v136_v11 = vld [vmem:[#allocation5 + $0x88] sm:$0xff]  ;;  %v138_v13 = vld [vmem:[#allocation5 + $0x98] sm:$0xff]  ;;  %v536_v14 = vpack.c.bf16 %v47_v9, %v46_v8 }
  0x2a   :  { %531 = vmatpush3.bf16.msra.mxu0 %v530_v5  ;;  %v554_v15 = vpack.c.bf16 %v136_v11, %v135_v10  ;;  %v48_v16 = vld [vmem:[#allocation5 + $0x30] sm:$0xff]  ;;  %v49_v17 = vld [vmem:[#allocation5 + $0x38] sm:$0xff]  ;;  %v557_v18 = vpack.c.bf16 %v138_v13, %v137_v12  ;;  %v139_v19 = vld [vmem:[#allocation5 + $0xa0] sm:$0xff] }
  0x2b   :  { %532 = vmatprep.subr.bf16.mxu0 %v693_v0  ;;  %v140_v20 = vld [vmem:[#allocation5 + $0xa8] sm:$0xff]  ;;  %v539_v21 = vpack.c.bf16 %v49_v17, %v48_v16  ;;  %v50_v22 = vld [vmem:[#allocation5 + $0x40] sm:$0xff]  ;;  %v141_v25 = vld [vmem:[#allocation5 + $0xb0] sm:$0xff] }
  0x2c   :  { %555 = vmatpush3.bf16.msra.mxu1 %v554_v15  ;;  %v51_v23 = vld [vmem:[#allocation5 + $0x48] sm:$0xff]  ;;  %v560_v24 = vpack.c.bf16 %v140_v20, %v139_v19  ;;  %v142_v26 = vld [vmem:[#allocation5 + $0xb8] sm:$0xff]  ;;  %v52_v28 = vld [vmem:[#allocation5 + $0x50] sm:$0xff] }
  0x2d   :  { %556 = vmatprep.subr.bf16.mxu1 %v693_v0  ;;  %v542_v27 = vpack.c.bf16 %v51_v23, %v50_v22  ;;  %v53_v29 = vld [vmem:[#allocation5 + $0x58] sm:$0xff]  ;;  %v563_v30 = vpack.c.bf16 %v142_v26, %v141_v25  ;;  %v143_v31 = vld [vmem:[#allocation5 + $0xc0] sm:$0xff]  ;;  %v144_v32 = vld [vmem:[#allocation5 + $0xc8] sm:$0xff] }
  0x2e   :  { %534 = vmatpush3.bf16.msra.mxu0 %v533_v7  ;;  %v545_v33 = vpack.c.bf16 %v53_v29, %v52_v28  ;;  %v54_v34 = vld [vmem:[#allocation5 + $0x60] sm:$0xff]  ;;  %v55_v35 = vld [vmem:[#allocation5 + $0x68] sm:$0xff]  ;;  %v566_v36 = vpack.c.bf16 %v144_v32, %v143_v31  ;;  %v145_v37 = vld [vmem:[#allocation5 + $0xd0] sm:$0xff] }
  0x2f   :  { %535 = vmatprep.subr.bf16.mxu0 %v693_v0  ;;  %v146_v38 = vld [vmem:[#allocation5 + $0xd8] sm:$0xff]  ;;  %v548_v39 = vpack.c.bf16 %v55_v35, %v54_v34  ;;  %v56_v40 = vld [vmem:[#allocation5 + $0x70] sm:$0xff]  ;;  %v147_v43 = vld [vmem:[#allocation5 + $0xe0] sm:$0xff] }
  0x30   :  { %558 = vmatpush3.bf16.msra.mxu1 %v557_v18  ;;  %v57_v41 = vld [vmem:[#allocation5 + $0x78] sm:$0xff]  ;;  %v569_v42 = vpack.c.bf16 %v146_v38, %v145_v37  ;;  %v148_v44 = vld [vmem:[#allocation5 + $0xe8] sm:$0xff]  ;;  %v149_v48 = vld [vmem:[#allocation5 + $0xf0] sm:$0xff] }
  0x31   :  { %559 = vmatprep.subr.bf16.mxu1 %v693_v0  ;;  %v551_v45 = vpack.c.bf16 %v57_v41, %v56_v40  ;;  %v572_v46 = vpack.c.bf16 %v148_v44, %v147_v43  ;;  %v41_v47 = vld [vmem:[#allocation2] sm:$0xff]  ;;  %v228_v51 = vld [vmem:[#allocation5 + $0x100] sm:$0xff]  ;;  %v229_v52 = vld [vmem:[#allocation5 + $0x108] sm:$0xff] }
  0x32   :  { %537 = vmatpush3.bf16.msra.mxu0 %v536_v14  ;;  %v150_v49 = vld [vmem:[#allocation5 + $0xf8] sm:$0xff]  ;;  %v230_v53 = vld [vmem:[#allocation5 + $0x110] sm:$0xff]  ;;  %v578_v54 = vpack.c.bf16 %v229_v52, %v228_v51  ;;  %v232_v57 = vld [vmem:[#allocation5 + $0x120] sm:$0xff] }
  0x33   :  { %538 = vmatprep.subr.bf16.mxu0 %v693_v0  ;;  %v575_v50 = vpack.c.bf16 %v150_v49, %v149_v48  ;;  %v231_v55 = vld [vmem:[#allocation5 + $0x118] sm:$0xff]  ;;  %v233_v58 = vld [vmem:[#allocation5 + $0x128] sm:$0xff]  ;;  %v234_v60 = vld [vmem:[#allocation5 + $0x130] sm:$0xff] }
  0x34   :  { %561 = vmatpush3.bf16.msra.mxu1 %v560_v24  ;;  %v581_v56 = vpack.c.bf16 %v231_v55, %v230_v53  ;;  %v584_v59 = vpack.c.bf16 %v233_v58, %v232_v57  ;;  %v235_v61 = vld [vmem:[#allocation5 + $0x138] sm:$0xff]  ;;  %v236_v63 = vld [vmem:[#allocation5 + $0x140] sm:$0xff]  ;;  %v238_v3 = vld [vmem:[#allocation5 + $0x150] sm:$0xff] }
  0x35   :  { %562 = vmatprep.subr.bf16.mxu1 %v693_v0  ;;  %v587_v62 = vpack.c.bf16 %v235_v61, %v234_v60  ;;  %v239_v4 = vld [vmem:[#allocation5 + $0x158] sm:$0xff]  ;;  %v240_v6 = vld [vmem:[#allocation5 + $0x160] sm:$0xff]  ;;  %v241_v7 = vld [vmem:[#allocation5 + $0x168] sm:$0xff] }
  0x36   :  { %540 = vmatpush3.bf16.msra.mxu0 %v539_v21  ;;  %v593_v5 = vpack.c.bf16 %v239_v4, %v238_v3  ;;  %v596_v8 = vpack.c.bf16 %v241_v7, %v240_v6  ;;  %v369_v9 = vld [vmem:[%s810_s2] ss:$0 sm:$0xff]  ;;  %v242_v14 = vld [vmem:[#allocation5 + $0x170] sm:$0xff]  ;;  %v370_v17 = vld [vmem:[%s810_s2 + $0x1] ss:$0 sm:$0xff]  ;;  %v319_v21 = vlaneseq }
  0x37   :  { %541 = vmatprep.subr.bf16.mxu0 %v693_v0  ;;  %v243_v15 = vld [vmem:[#allocation5 + $0x178] sm:$0xff] }
  0x38   :  { %564 = vmatpush3.bf16.msra.mxu1 %v563_v30  ;;  %v599_v16 = vpack.c.bf16 %v243_v15, %v242_v14  ;;  %v320_v22 = vand.u32 127, %v319_v21  ;;  %v371_v23 = vld [vmem:[%s810_s2 + $0x2] ss:$0 sm:$0xff]  ;;  %s696_s2 = smov [#allocation7]  }
  0x39   :  { %565 = vmatprep.subr.bf16.mxu1 %v693_v0  ;;  %s359_s15 = sshll.u32 %s696_s2, 4  ;;  %s360_s15 = int_to_ptr.vmem [resolvable:$true] %s359_s15 }
  0x3a   :  { %543 = vmatpush3.bf16.msra.mxu0 %v542_v27  ;;  %vm321_vm1 = vcmp.lt.s32.totalorder %v320_v22, 8  ;;  %vm322_vm2 = vcmp.ge.s32.totalorder %v320_v22, 16  ;;  %vm323_vm3 = vcmp.lt.s32.totalorder %v320_v22, 24  ;;  %s661_s16 = scalar_lea.vmem %s360_s15, 128  ;;  %p666_p3 = scmp.lt.s32.totalorder %s360_s15, %s360_s15 }
  0x3b   :  { %544 = vmatprep.subr.bf16.mxu0 %v693_v0  ;;  %vm788_vm5 = vmand %vm322_vm2, %vm323_vm3  ;;  %p662_p2 = scmp.ne.s32.totalorder %s360_s15, %s661_s16  ;;  %p667_p4 = scmp.lt.s32.totalorder %s661_s16, %s661_s16 }
  0x3c   :  { %567 = vmatpush3.bf16.msra.mxu1 %v566_v36 }
  0x3d   :  { %568 = vmatprep.subr.bf16.mxu1 %v693_v0  ;;  %p668_p5 = por %p667_p4, %p666_p3 }
  0x3e   :  { %546 = vmatpush3.bf16.msra.mxu0 %v545_v33 }
  0x3f   :  { %547 = vmatprep.subr.bf16.mxu0 %v693_v0  ;;  %p669_p6 = pnand %p668_p5, %p662_p2 }
  0x40   :  { %570 = vmatpush3.bf16.msra.mxu1 %v569_v42 }
  0x41   :  { %571 = vmatprep.subr.bf16.mxu1 %v693_v0 }
  0x42   :  { %549 = vmatpush3.bf16.msra.mxu0 %v548_v39 }
  0x43   :  { %550 = vmatprep.subr.bf16.mxu0 %v693_v0 }
  0x44   :  { %573 = vmatpush3.bf16.msra.mxu1 %v572_v46 }
  0x45   :  { %574 = vmatprep.subr.bf16.mxu1 %v693_v0 }
  0x46   :  { %552 = vmatpush3.bf16.msra.mxu0 %v551_v45 }
  0x47   :  { %577 = vmatprep.subr.bf16.mxu0 %v693_v0 }
  0x48   :  { %576 = vmatpush3.bf16.msra.mxu1 %v575_v50 }
  0x49   :  { %457 = vmatmul.mubr.f32.vlgmr.msra.gmra.mrb[0].mxu0 %v41_v47 }
  0x4a   :  { %526 = vmatprep.mubr.msk.f32.mxu0 %vm694_vm0, %v695_v1  ;;  %579 = vmatpush3.bf16.msra.mxu0 %v578_v54  ;;  %v237_v1 = vld [vmem:[#allocation5 + $0x148] sm:$0xff] }
  0x4b   :  { %580 = vmatprep.subr.bf16.mxu0 %v693_v0  ;;  %v590_v2 = vpack.c.bf16 %v237_v1, %v236_v63 }
  0x4e   :  { %582 = vmatpush3.bf16.msra.mxu0 %v581_v56 }
  0x4f   :  { %583 = vmatprep.subr.bf16.mxu0 %v693_v0 }
  0x52   :  { %585 = vmatpush3.bf16.msra.mxu0 %v584_v59 }
  0x53   :  { %586 = vmatprep.subr.bf16.mxu0 %v693_v0 }
  0x56   :  { %588 = vmatpush3.bf16.msra.mxu0 %v587_v62 }
  0x57   :  { %589 = vmatprep.subr.bf16.mxu0 %v693_v0 }
  0x5a   :  { %591 = vmatpush3.bf16.msra.mxu0 %v590_v2 }
  0x5b   :  { %592 = vmatprep.subr.bf16.mxu0 %v693_v0 }
  0x5e   :  { %594 = vmatpush3.bf16.msra.mxu0 %v593_v5 }
  0x5f   :  { %595 = vmatprep.subr.bf16.mxu0 %v693_v0 }
  0x62   :  { %597 = vmatpush3.bf16.msra.mxu0 %v596_v8 }
  0x63   :  { %598 = vmatprep.subr.bf16.mxu0 %v693_v0 }
  0x66   :  { %600 = vmatpush3.bf16.msra.mxu0 %v599_v16 }
 0x11c   :  { %v129_v10 = vpop.f32.mrb[0].mxu0 }
 0x11d   :  { %v130_v11 = vadd.f32 %v369_v9, %v129_v10  ;;  %v458_v12 = vpop.f32.mrb[1].mxu0 }
 0x11f   :  { %v133_v13 = vmax.f32 %v130_v11, 0.0 }
 0x121   :  { %492 = vmatmul.mubr.f32.vlgmr.msra.gmra.mrb[0].mxu1 %v133_v13 }
 0x1f4   :  { %v222_v18 = vpop.f32.mrb[0].mxu1 }
 0x1f5   :  { %v223_v19 = vadd.f32 %v370_v17, %v222_v18  ;;  %v493_v0 = vpop.f32.mrb[1].mxu1 }
 0x1f7   :  { %v226_v20 = vmax.f32 %v223_v19, 0.0 }
 0x1f9   :  { %527 = vmatmul.mubr.f32.vlgmr.msra.gmra.mrb[2].mxu0 %v226_v20 }
 0x2cc   :  { %v315_v24 = vpop.f32.mrb[2].mxu0 }
 0x2cd   :  { %v316_v25 = vadd.f32 %v371_v23, %v315_v24  ;;  %v528_v26 = vpop.f32.mrb[3].mxu0 }
 0x2cf   :  { %v372_v27 = vclamps-f32 %v316_v25, 10.0  ;;  %v325_v28 = vsel %vm321_vm1, %v316_v25, -inf }
 0x2d0   :  { %326 = vmax.xlane.f32.xlu0 %v325_v28 }
 0x2d1   :  { %v338_v29 = vmul.f32 1.442695, %v372_v27 }
 0x2d3   :  { %609 = vpow2.f32 %v338_v29 }
 0x2dd   :  { %v610_v30 = vpop.eup %609 }
 0x2de   :  { %v340_v31 = vadd.f32 1.0, %v610_v30  ;;  %v343_v32 = vmul.f32 -0.5, %v610_v30  ;;  %v346_v34 = vand.u32 2147483647, %v610_v30 }
 0x2e0   :  { %611 = vlog2.f32 %v340_v31  ;;  %v344_v33 = vadd.f32 1.0, %v343_v32  ;;  %vm347_vm4 = vcmp.lt.f32.partialorder %v346_v34, 0.0004427343 }
 0x2e2   :  { %v345_v37 = vmul.f32 %v610_v30, %v344_v33 }
 0x2ea   :  { %v612_v35 = vpop.eup %611 }
 0x2eb   :  { %v342_v36 = vmul.f32 0.6931472, %v612_v35 }
 0x2ed   :  { %v348_v39 = vsel %vm347_vm4, %v345_v37, %v342_v36 }
 0x2ee   :  { %v349_v40 = vadd.f32 1e-06, %v348_v39 }
 0x2f0   :  { %v350_v41 = vsel %vm788_vm5, %v349_v40, %v316_v25 }
 0x35d   :  { %v327_v42 = vpop.xlane.xlu0 %326 }
 0x35e   :  { %v328_v43 = vsub.f32 %v325_v28, %v327_v42 }
 0x360   :  { %v329_v44 = vmul.f32 1.442695, %v328_v43 }
 0x362   :  { %613 = vpow2.f32 %v329_v44 }
 0x36c   :  { %v614_v45 = vpop.eup %613 }
 0x36d   :  { %v331_v46 = vsel %vm321_vm1, %v614_v45, 0.0 }
 0x36e   :  { %332 = vadd.xlane.f32.xlu0 %v331_v46 }
 0x3fb   :  { %v333_v47 = vpop.xlane.xlu0 %332 }
 0x3fc   :  { %615 = vrcp.f32 %v333_v47 }
 0x406   :  { %v616_v48 = vpop.eup %615 }
 0x407   :  { %v335_v49 = vmul.f32 %v616_v48, %v331_v46 }
 0x409   :  { %v351_v50 = vsel %vm321_vm1, %v335_v49, %v350_v41 }
 0x40a   :  { %352 = vst [vmem:[#allocation7] sm:$0xff] %v351_v50 }
 0x40b   :  { %672 = shalt.err (!%p669_p6)
}
 0x40c   :  { %s673_s19 = scalar_lea.hbm %s811_s3, 128 }
 0x40d   :  { %p674_p7 = scmp.ne.s32.totalorder %s811_s3, %s673_s19  ;;  %p677_p8 = scmp.lt.u32.totalorder %s673_s19, %s811_s3 }
 0x40f   :  { %p679_p9 = pnand %p677_p8, %p674_p7 }
 0x411   :  { %682 = shalt.err (!%p679_p9)
}
 0x412   :  { %362 = dma.vmem_to_hbm [thread:$0]  %s360_s15, 128, %s811_s3, [#allocation4]  }
 0x413   :  { %687 = dma.done.wait [#allocation4], 128  }
 0x414   :  { %688 = vsyncadd [#allocation4], 4294967168 }
 0x415   :  { %366 = vsyncpa [#allocation3], 1 }
 0x416   :  { %367 = vsyncpa [#allocation6], 1 }
 0x417   :  { %368 = vsyncpa [#allocation4], 1 }

</bundles_post_ra>
